<compile_context>
chip_gen: v7x
topology: tpu7x:2x2x1
jax: 0.10.0
libtpu: 0.0.40
codegen_flags: <defaults>
</compile_context>

<pallas_src>
import functools

import jax
import jax.numpy as jnp
from jax import lax
from jax.experimental import pallas as pl
from jax.experimental.pallas import tpu as pltpu


def _round_up(x, m):
    return (x + m - 1) // m * m


# --------------------------------------------------------------------------
# kernel
# --------------------------------------------------------------------------
def ftwrapped_kernel(x_ref, w1_ref, b1_ref, w2_ref, scal_ref, *rest,
                     tb, num_blocks, batch, padded, eps, gamma, compute_loss):
    if compute_loss:
        y_ref, logits_ref, loss_ref, zbuf = rest
    else:
        logits_ref, zbuf = rest

    r_tiles = tb // 128

    # ---- ft_base forward (batch on the lane axis) ----
    # (H, F) @ (F, TB) -> (H, TB), f32 accumulate on the MXU.
    h = jnp.dot(w1_ref[...], x_ref[...], preferred_element_type=jnp.float32)
    h = jnp.maximum(h + b1_ref[...], 0.0)                       # (H, TB) f32

    b2 = scal_ref[0]
    # (1, H) @ (H, TB) -> (1, TB): lane-dense logits row.
    z = jnp.dot(w2_ref[...], h, preferred_element_type=jnp.float32) + b2

    # Restage (1, TB) -> (TB/128, 128): static 128-lane slices + one-sublane
    # stores (guaranteed-lowerable relayout).  Gives sublane-dense logits
    # write-out and a dense loss path.
    for r in range(r_tiles):
        zbuf[pl.ds(r, 1), :] = z[:, r * 128:(r + 1) * 128]
    zd = zbuf[...]                                              # (R, 128) f32
    logits_ref[...] = zd.astype(logits_ref.dtype)

    if not compute_loss:
        return

    i = pl.program_id(0)

    y = y_ref[...]                                              # (R, 128) f32
    if eps > 0.0:                                               # label smoothing
        y = y * (1.0 - eps) + 0.5 * eps

    pw = scal_ref[1]                                            # pos_weight

    # BCEWithLogits: pw*y*softplus(-z) + (1-y)*softplus(z); one shared
    # exp(-|z|)/log1p feeds softplus(z), softplus(-z) and the focal sigmoid.
    a = jnp.exp(-jnp.abs(zd))
    l1p = jnp.log1p(a)
    sp_pos = jnp.maximum(zd, 0.0) + l1p                         # softplus(z)
    sp_neg = jnp.maximum(-zd, 0.0) + l1p                        # softplus(-z)
    bce = pw * y * sp_neg + (1.0 - y) * sp_pos

    if gamma is not None and gamma > 0.0:
        # 1 - sigmoid(z) = sigmoid(-z) = where(z>=0, a, 1) / (1 + a)
        one_m_p = jnp.where(zd >= 0.0, a, 1.0) / (1.0 + a)      # exact
        if float(gamma).is_integer() and 1.0 <= gamma <= 4.0:
            f = one_m_p
            for _ in range(int(gamma) - 1):                     # gamma=2 -> square
                f = f * one_m_p
        else:
            f = jnp.power(jnp.maximum(one_m_p, 1e-30), gamma)
        bce = f * bce

    # per-block partial sum (reduced + divided by the true batch in the
    # wrapper -> the grid stays fully parallel, no resident accumulator).
    loss_ref[...] = jnp.sum(bce).reshape(1, 1)

    if padded:
        @pl.when(i == num_blocks - 1)
        def _mask_last_block():
            gidx = (i * tb
                    + lax.broadcasted_iota(jnp.int32, bce.shape, 0) * 128
                    + lax.broadcasted_iota(jnp.int32, bce.shape, 1))
            loss_ref[...] = jnp.sum(
                jnp.where(gidx < batch, bce, 0.0)).reshape(1, 1)


# --------------------------------------------------------------------------
# sizing helpers (generation-aware VMEM budget)
# --------------------------------------------------------------------------
def _tile_bytes(r, c, itemsize):
    sub = max(8, 32 // max(itemsize, 1))          # f32:8, bf16:16, int8/fp8:32
    return _round_up(max(r, 1), sub) * _round_up(max(c, 1), 128) * itemsize


def _vmem_estimate(tb, f, h, x_isz, out_isz):
    r = tb // 128
    est = 2 * _tile_bytes(f, tb, x_isz)           # x block (double-buffered)
    est += 2 * _tile_bytes(h, f, x_isz)           # w1^T (resident, 2 bufs)
    est += 2 * _tile_bytes(h, 1, 4)               # b1 column
    est += 2 * _tile_bytes(1, h, 4)               # w2 row
    est += 2 * _tile_bytes(r, 128, 4)             # labels slab
    est += 2 * _tile_bytes(r, 128, out_isz)       # logits slab
    est += 2 * _tile_bytes(1, 1, 4)               # per-block loss partial
    est += _tile_bytes(r, 128, 4)                 # z staging scratch
    est += 2 * _tile_bytes(h, tb, 4)              # compiler-materialized (H,TB) h
    est += 8 * _tile_bytes(r, 128, 4)             # loss-temp spill headroom
    return est


def _vmem_capacity_bytes():
    try:
        cap = int(getattr(pltpu.get_tpu_info(), "vmem_capacity_bytes", 0))
        if cap > 0:
            return cap
    except Exception:
        pass
    return 64 * 2**20                             # conservative (v7x physical)


def _pick_tb(batch, f, h, x_isz, out_isz, cap, block_batch=None):
    b_cap = _round_up(batch, 128)
    if block_batch is None:
        # target ~2 MiB of real x data per block; cap keeps the unrolled
        # (1,TB)->(R,128) staging loop short (R <= 64).
        tb = _round_up((2 * 2**20) // max(f * x_isz, 1), 128)
        tb = min(tb, 8192)
    else:
        tb = _round_up(int(block_batch), 128)
    tb = max(128, min(tb, b_cap))
    budget = cap // 3
    while tb > 128 and _vmem_estimate(tb, f, h, x_isz, out_isz) > budget:
        tb = max(128, _round_up(tb // 2, 128))
    return tb


# --------------------------------------------------------------------------
# wrapper
# --------------------------------------------------------------------------
def ftwrapped_forward(x_num, params, labels=None, pos_weight=None, *,
                      label_smooth_eps=0.0, focal_gamma=None, block_batch=None):
    B, F = x_num.shape
    H = params["w1"].shape[1]
    assert params["w1"].shape == (F, H)

    out_dtype = x_num.dtype
    x_isz = x_num.dtype.itemsize
    out_isz = jnp.dtype(out_dtype).itemsize

    cap = _vmem_capacity_bytes()
    tb = _pick_tb(B, F, H, x_isz, out_isz, cap, block_batch)
    b_pad = _round_up(B, tb)
    nb = b_pad // tb
    r_tiles = tb // 128
    padded = b_pad != B

    # batch-on-lanes layout: x transposed to (F, B_pad).
    # TODO(synk): ideally the caller stores x feature-major so this transpose
    #             (one extra HBM roundtrip of x) disappears entirely.
    x_t = x_num.T
    if padded:
        x_t = jnp.pad(x_t, ((0, 0), (0, b_pad - B)))

    w1t = params["w1"].T.astype(x_num.dtype)                    # (H, F), MXU-homogeneous
    b1 = jnp.asarray(params["b1"], jnp.float32).reshape(H, 1)   # column vector
    w2 = jnp.asarray(params["w2"], jnp.float32).reshape(1, H)   # row vector
    scal = jnp.stack([
        jnp.asarray(params["b2"], jnp.float32).reshape(()),
        jnp.asarray(1.0 if pos_weight is None else pos_weight,
                    jnp.float32).reshape(()),
    ])

    compute_loss = labels is not None
    kernel = functools.partial(
        ftwrapped_kernel, tb=tb, num_blocks=nb, batch=B, padded=padded,
        eps=float(label_smooth_eps),
        gamma=None if focal_gamma is None else float(focal_gamma),
        compute_loss=compute_loss)

    in_specs = [
        pl.BlockSpec((F, tb), lambda i: (0, i)),                # x^T: streamed
        pl.BlockSpec((H, F), lambda i: (0, 0)),                 # w1^T: resident
        pl.BlockSpec((H, 1), lambda i: (0, 0)),                 # b1: resident
        pl.BlockSpec((1, H), lambda i: (0, 0)),                 # w2 row: resident
        pl.BlockSpec(memory_space=pltpu.MemorySpace.SMEM),      # [b2, pos_weight]
    ]
    args = [x_t, w1t, b1, w2, scal]

    out_shape = [jax.ShapeDtypeStruct((b_pad // 128, 128), out_dtype)]
    out_specs = [pl.BlockSpec((r_tiles, 128), lambda i: (i, 0))]

    if compute_loss:
        y = jnp.asarray(labels, jnp.float32).reshape(B)
        if padded:
            y = jnp.pad(y, (0, b_pad - B))
        args.append(y.reshape(b_pad // 128, 128))
        in_specs.append(pl.BlockSpec((r_tiles, 128), lambda i: (i, 0)))
        out_shape.append(jax.ShapeDtypeStruct((nb, 1, 1), jnp.float32))
        out_specs.append(pl.BlockSpec((None, 1, 1), lambda i: (i, 0, 0)))

    est = _vmem_estimate(tb, F, H, x_isz, out_isz)
    vmem_limit = int(min(cap * 9 // 10, max(32 * 2**20, 2 * est)))

    outs = pl.pallas_call(
        kernel,
        out_shape=tuple(out_shape),
        grid_spec=pltpu.PrefetchScalarGridSpec(
            num_scalar_prefetch=0,
            grid=(nb,),
            in_specs=in_specs,
            out_specs=tuple(out_specs),
            scratch_shapes=[pltpu.VMEM((r_tiles, 128), jnp.float32)]),
        compiler_params=pltpu.CompilerParams(
            # per-block loss partials -> no cross-step carry -> fully parallel
            # even on the training path (v7x: both TensorCores).
            dimension_semantics=("parallel",),
            vmem_limit_bytes=vmem_limit),
    )(*args)

    logits = outs[0].reshape(-1)[:B]
    loss = (jnp.sum(outs[1]) * (1.0 / B)) if compute_loss else None
    return {"logits": logits, "loss": loss}


# --------------------------------------------------------------------------
# pure-JAX reference (mirrors the PyTorch module; weights rounded to the
# activation dtype exactly like the wrapper does)
# --------------------------------------------------------------------------
def _reference(x_num, params, labels, pos_weight, eps, gamma):
    x = x_num.astype(jnp.float32)
    w1 = params["w1"].astype(x_num.dtype).astype(jnp.float32)
    h = jnp.maximum(jnp.dot(x, w1, precision=lax.Precision.HIGHEST)
                    + params["b1"], 0.0)
    logits = (jnp.dot(h, params["w2"], precision=lax.Precision.HIGHEST)
              + params["b2"])[:, 0]
    y = labels * (1.0 - eps) + 0.5 * eps if eps > 0.0 else labels
    sp = lambda t: jnp.maximum(t, 0.0) + jnp.log1p(jnp.exp(-jnp.abs(t)))
    bce = pos_weight * y * sp(-logits) + (1.0 - y) * sp(logits)
    if gamma is not None and gamma > 0.0:
        bce = (1.0 - jax.nn.sigmoid(logits)) ** gamma * bce
    return logits, jnp.mean(bce)


if __name__ == "__main__":
    B, F, H = 8, 16, 32
    key = jax.random.PRNGKey(0)
    kx, ky, k1, k2, k3, k4 = jax.random.split(key, 6)

    # bf16 activations: halves HBM traffic for x, MXU-native on all generations
    x_num = jax.random.normal(kx, (B, F), jnp.float32).astype(jnp.bfloat16)
    labels = jax.random.bernoulli(ky, 0.5, (B,)).astype(jnp.float32)

    params = {
        "w1": jax.random.normal(k1, (F, H), jnp.float32) * (1.0 / jnp.sqrt(F)),
        "b1": jax.random.normal(k2, (1, H), jnp.float32) * 0.01,
        "w2": jax.random.normal(k3, (H, 1), jnp.float32) * (1.0 / jnp.sqrt(H)),
        "b2": jax.random.normal(k4, (1, 1), jnp.float32) * 0.01,
    }
    pos_weight = jnp.asarray(1.3, jnp.float32)
    eps, gamma = 0.05, 2.0

    # training path (logits + loss)
    out = ftwrapped_forward(x_num, params, labels, pos_weight,
                            label_smooth_eps=eps, focal_gamma=gamma)
    logits = jax.block_until_ready(out["logits"])
    loss = jax.block_until_ready(out["loss"])

    # inference path (labels=None): loss block skipped entirely
    out_inf = ftwrapped_forward(x_num, params, None, pos_weight,
                                label_smooth_eps=eps, focal_gamma=gamma)
    logits_inf = jax.block_until_ready(out_inf["logits"])

    ref_logits, ref_loss = _reference(x_num, params, labels, pos_weight, eps, gamma)

    assert logits.shape == (B,) and loss.shape == ()
    assert out_inf["loss"] is None
    # logits are stored in the caller's dtype (bf16) -> looser tolerance
    assert jnp.allclose(logits.astype(jnp.float32), ref_logits, atol=1e-2, rtol=1e-2)
    assert jnp.allclose(logits_inf.astype(jnp.float32), ref_logits, atol=1e-2, rtol=1e-2)
    # loss math runs fully in f32 (shared-exp softplus/sigmoid, exact divide)
    assert jnp.allclose(loss, ref_loss, atol=1e-3, rtol=1e-3)

    # second check: multi-block grid + padded last block + per-block partials
    B2 = 300
    kx2, ky2 = jax.random.split(jax.random.PRNGKey(1), 2)
    x2 = jax.random.normal(kx2, (B2, F), jnp.float32).astype(jnp.bfloat16)
    y2 = jax.random.bernoulli(ky2, 0.5, (B2,)).astype(jnp.float32)
    out2 = ftwrapped_forward(x2, params, y2, pos_weight,
                             label_smooth_eps=eps, focal_gamma=gamma,
                             block_batch=128)
    logits2 = jax.block_until_ready(out2["logits"])
    loss2 = jax.block_until_ready(out2["loss"])
    ref_logits2, ref_loss2 = _reference(x2, params, y2, pos_weight, eps, gamma)
    assert logits2.shape == (B2,)
    assert jnp.allclose(logits2.astype(jnp.float32), ref_logits2, atol=1e-2, rtol=1e-2)
    assert jnp.allclose(loss2, ref_loss2, atol=1e-3, rtol=1e-3)

    print("KERNEL_OK")
</pallas_src>

<mosaic_0001>
module attributes {stable_mosaic.version = 11 : i64} {
  func.func @ftwrapped_kernel(%arg0: i32, %arg1: memref<16x128xbf16, #tpu.memory_space<vmem>>, %arg2: memref<32x16xbf16, #tpu.memory_space<vmem>>, %arg3: memref<32x1xf32, #tpu.memory_space<vmem>>, %arg4: memref<1x32xf32, #tpu.memory_space<vmem>>, %arg5: memref<2xf32, #tpu.memory_space<smem>>, %arg6: memref<1x128xf32, #tpu.memory_space<vmem>>, %arg7: memref<1x128xbf16, #tpu.memory_space<vmem>>, %arg8: memref<1x1x1xf32, #tpu.memory_space<vmem>>, %arg9: memref<1x128xf32, #tpu.memory_space<vmem>>) attributes {dimension_semantics = [#tpu.dimension_semantics<parallel>], iteration_bounds = array<i64: 1>, scalar_prefetch = 0 : i64, scratch_operands = 1 : i64, tpu.core_type = #tpu.core_type<tc>, window_params = [{transform_indices = @transform_0, window_bounds = array<i64: 16, 128>}, {pipeline_mode = #tpu.pipeline_mode<synchronous>, transform_indices = @transform_1, window_bounds = array<i64: 32, 16>}, {pipeline_mode = #tpu.pipeline_mode<synchronous>, transform_indices = @transform_2, window_bounds = array<i64: 32, 1>}, {pipeline_mode = #tpu.pipeline_mode<synchronous>, transform_indices = @transform_3, window_bounds = array<i64: 1, 32>}, {transform_indices = @transform_4, window_bounds = array<i64: 2>}, {transform_indices = @transform_5, window_bounds = array<i64: 1, 128>}, {transform_indices = @transform_6, window_bounds = array<i64: 1, 128>}, {transform_indices = @transform_7, window_bounds = array<i64: 1, 1, 1>}]} {
    %c0 = arith.constant 0 : index
    %c0_0 = arith.constant 0 : index
    %0 = vector.load %arg2[%c0, %c0_0] : memref<32x16xbf16, #tpu.memory_space<vmem>>, vector<32x16xbf16>
    %c0_1 = arith.constant 0 : index
    %c0_2 = arith.constant 0 : index
    %1 = vector.load %arg1[%c0_1, %c0_2] : memref<16x128xbf16, #tpu.memory_space<vmem>>, vector<16x128xbf16>
    %cst = arith.constant dense<0.000000e+00> : vector<32x128xf32>
    %2 = tpu.matmul %0, %1, %cst {dimension_numbers = #tpu.dot_dimension_numbers<[1], [0], [0], [1], [0, 0, 1, 1], [], []>} : vector<32x16xbf16>, vector<16x128xbf16>, vector<32x128xf32> -> vector<32x128xf32>
    %c0_3 = arith.constant 0 : index
    %c0_4 = arith.constant 0 : index
    %3 = vector.load %arg3[%c0_3, %c0_4] : memref<32x1xf32, #tpu.memory_space<vmem>>, vector<32x1xf32>
    %4 = vector.broadcast %3 : vector<32x1xf32> to vector<32x128xf32>
    %5 = arith.addf %2, %4 : vector<32x128xf32>
    %cst_5 = arith.constant 0.000000e+00 : f32
    %6 = vector.broadcast %cst_5 : f32 to vector<32x128xf32>
    %7 = arith.maximumf %5, %6 : vector<32x128xf32>
    %c0_6 = arith.constant 0 : index
    %8 = memref.load %arg5[%c0_6] : memref<2xf32, #tpu.memory_space<smem>>
    %c0_7 = arith.constant 0 : index
    %c0_8 = arith.constant 0 : index
    %9 = vector.load %arg4[%c0_7, %c0_8] : memref<1x32xf32, #tpu.memory_space<vmem>>, vector<1x32xf32>
    %cst_9 = arith.constant dense<0.000000e+00> : vector<1x128xf32>
    %10 = tpu.matmul %9, %7, %cst_9 {dimension_numbers = #tpu.dot_dimension_numbers<[1], [0], [0], [1], [0, 0, 1, 1], [], []>} : vector<1x32xf32>, vector<32x128xf32>, vector<1x128xf32> -> vector<1x128xf32>
    %11 = vector.broadcast %8 : f32 to vector<1x128xf32>
    %12 = arith.addf %10, %11 : vector<1x128xf32>
    %c0_10 = arith.constant 0 : index
    %c0_11 = arith.constant 0 : index
    %13 = vector.load %arg9[%c0_10, %c0_11] : memref<1x128xf32, #tpu.memory_space<vmem>>, vector<1x128xf32>
    tpu.vector_store %arg9[%c0_10, %c0_11], %12 {strides = array<i32>} : memref<1x128xf32, #tpu.memory_space<vmem>>, vector<1x128xf32>,
    %c0_12 = arith.constant 0 : index
    %c0_13 = arith.constant 0 : index
    %14 = vector.load %arg9[%c0_12, %c0_13] : memref<1x128xf32, #tpu.memory_space<vmem>>, vector<1x128xf32>
    %15 = arith.truncf %14 : vector<1x128xf32> to vector<1x128xbf16>
    %c0_14 = arith.constant 0 : index
    %c0_15 = arith.constant 0 : index
    %16 = vector.load %arg7[%c0_14, %c0_15] : memref<1x128xbf16, #tpu.memory_space<vmem>>, vector<1x128xbf16>
    tpu.vector_store %arg7[%c0_14, %c0_15], %15 {strides = array<i32>} : memref<1x128xbf16, #tpu.memory_space<vmem>>, vector<1x128xbf16>,
    %c0_16 = arith.constant 0 : index
    %c0_17 = arith.constant 0 : index
    %17 = vector.load %arg6[%c0_16, %c0_17] : memref<1x128xf32, #tpu.memory_space<vmem>>, vector<1x128xf32>
    %cst_18 = arith.constant 0.949999988 : f32
    %18 = vector.broadcast %cst_18 : f32 to vector<1x128xf32>
    %19 = arith.mulf %17, %18 : vector<1x128xf32>
    %cst_19 = arith.constant 2.500000e-02 : f32
    %20 = vector.broadcast %cst_19 : f32 to vector<1x128xf32>
    %21 = arith.addf %19, %20 : vector<1x128xf32>
    %c1 = arith.constant 1 : index
    %22 = memref.load %arg5[%c1] : memref<2xf32, #tpu.memory_space<smem>>
    %23 = math.absf %14 : vector<1x128xf32>
    %cst_20 = arith.constant 0.000000e+00 : f32
    %24 = vector.broadcast %cst_20 : f32 to vector<1x128xf32>
    %25 = arith.subf %24, %23 : vector<1x128xf32>
    %26 = math.exp %25 : vector<1x128xf32>
    %27 = math.log1p %26 : vector<1x128xf32>
    %cst_21 = arith.constant 0.000000e+00 : f32
    %28 = vector.broadcast %cst_21 : f32 to vector<1x128xf32>
    %29 = arith.maximumf %14, %28 : vector<1x128xf32>
    %30 = arith.addf %29, %27 : vector<1x128xf32>
    %cst_22 = arith.constant 0.000000e+00 : f32
    %31 = vector.broadcast %cst_22 : f32 to vector<1x128xf32>
    %32 = arith.subf %31, %14 : vector<1x128xf32>
    %cst_23 = arith.constant 0.000000e+00 : f32
    %33 = vector.broadcast %cst_23 : f32 to vector<1x128xf32>
    %34 = arith.maximumf %32, %33 : vector<1x128xf32>
    %35 = arith.addf %34, %27 : vector<1x128xf32>
    %36 = vector.broadcast %22 : f32 to vector<1x128xf32>
    %37 = arith.mulf %36, %21 : vector<1x128xf32>
    %38 = arith.mulf %37, %35 : vector<1x128xf32>
    %cst_24 = arith.constant 1.000000e+00 : f32
    %39 = vector.broadcast %cst_24 : f32 to vector<1x128xf32>
    %40 = arith.subf %39, %21 : vector<1x128xf32>
    %41 = arith.mulf %40, %30 : vector<1x128xf32>
    %42 = arith.addf %38, %41 : vector<1x128xf32>
    %cst_25 = arith.constant 0.000000e+00 : f32
    %43 = vector.broadcast %cst_25 : f32 to vector<1x128xf32>
    %44 = arith.cmpf oge, %14, %43 : vector<1x128xf32>
    %cst_26 = arith.constant 1.000000e+00 : f32
    %45 = vector.broadcast %cst_26 : f32 to vector<1x128xf32>
    %46 = arith.select %44, %26, %45 : vector<1x128xi1>, vector<1x128xf32>
    %cst_27 = arith.constant 1.000000e+00 : f32
    %47 = vector.broadcast %cst_27 : f32 to vector<1x128xf32>
    %48 = arith.addf %47, %26 : vector<1x128xf32>
    %49 = arith.divf %46, %48 : vector<1x128xf32>
    %50 = arith.mulf %49, %49 : vector<1x128xf32>
    %51 = arith.mulf %50, %42 : vector<1x128xf32>
    %52 = vector.shape_cast %51 : vector<1x128xf32> to vector<1x1x128xf32>
    %cst_28 = arith.constant dense<0.000000e+00> : vector<1xf32>
    %53 = vector.multi_reduction <add>, %52, %cst_28 [1, 2] : vector<1x1x128xf32> to vector<1xf32>
    %54 = vector.shape_cast %53 : vector<1xf32> to vector<1x1x1xf32>
    %55 = vector.extract %54[0, 0, 0] : f32 from vector<1x1x1xf32>
    %56 = vector.broadcast %55 : f32 to vector<1x1xf32>
    %c0_29 = arith.constant 0 : index
    %c0_30 = arith.constant 0 : index
    %c0_31 = arith.constant 0 : index
    %57 = vector.load %arg8[%c0_29, %c0_30, %c0_31] : memref<1x1x1xf32, #tpu.memory_space<vmem>>, vector<1x1x1xf32>
    %58 = vector.shape_cast %57 : vector<1x1x1xf32> to vector<1x1xf32>
    %59 = vector.shape_cast %56 : vector<1x1xf32> to vector<1x1x1xf32>
    tpu.vector_store %arg8[%c0_29, %c0_30, %c0_31], %59 {strides = array<i32>} : memref<1x1x1xf32, #tpu.memory_space<vmem>>, vector<1x1x1xf32>,
    %c0_i32 = arith.constant 0 : i32
    %60 = arith.cmpi eq, %arg0, %c0_i32 : i32
    %61 = arith.extui %60 : i1 to i32
    %c0_i32_32 = arith.constant 0 : i32
    %62 = arith.cmpi ne, %61, %c0_i32_32 : i32
    scf.if %62 {
      %c128_i32 = arith.constant 128 : i32
      %63 = arith.muli %arg0, %c128_i32 : i32
      %64 = tpu.iota {dimensions = array<i32: 0>} : vector<1x128xi32>
      %c128_i32_33 = arith.constant 128 : i32
      %65 = vector.broadcast %c128_i32_33 : i32 to vector<1x128xi32>
      %66 = arith.muli %64, %65 : vector<1x128xi32>
      %67 = vector.broadcast %63 : i32 to vector<1x128xi32>
      %68 = arith.addi %67, %66 : vector<1x128xi32>
      %69 = tpu.iota {dimensions = array<i32: 1>} : vector<1x128xi32>
      %70 = arith.addi %68, %69 : vector<1x128xi32>
      %c8_i32 = arith.constant 8 : i32
      %71 = vector.broadcast %c8_i32 : i32 to vector<1x128xi32>
      %72 = arith.cmpi slt, %70, %71 : vector<1x128xi32>
      %cst_34 = arith.constant 0.000000e+00 : f32
      %73 = vector.broadcast %cst_34 : f32 to vector<1x128xf32>
      %74 = arith.select %72, %51, %73 : vector<1x128xi1>, vector<1x128xf32>
      %75 = vector.shape_cast %74 : vector<1x128xf32> to vector<1x1x128xf32>
      %cst_35 = arith.constant dense<0.000000e+00> : vector<1xf32>
      %76 = vector.multi_reduction <add>, %75, %cst_35 [1, 2] : vector<1x1x128xf32> to vector<1xf32>
      %77 = vector.shape_cast %76 : vector<1xf32> to vector<1x1x1xf32>
      %78 = vector.extract %77[0, 0, 0] : f32 from vector<1x1x1xf32>
      %79 = vector.broadcast %78 : f32 to vector<1x1xf32>
      %c0_36 = arith.constant 0 : index
      %c0_37 = arith.constant 0 : index
      %c0_38 = arith.constant 0 : index
      %80 = vector.load %arg8[%c0_36, %c0_37, %c0_38] : memref<1x1x1xf32, #tpu.memory_space<vmem>>, vector<1x1x1xf32>
      %81 = vector.shape_cast %80 : vector<1x1x1xf32> to vector<1x1xf32>
      %82 = vector.shape_cast %79 : vector<1x1xf32> to vector<1x1x1xf32>
      tpu.vector_store %arg8[%c0_36, %c0_37, %c0_38], %82 {strides = array<i32>} : memref<1x1x1xf32, #tpu.memory_space<vmem>>, vector<1x1x1xf32>,
    } else {
    }
    return
  }
  func.func @transform_0(%arg0: i32) -> (i32, i32) {
    %c0_i32 = arith.constant 0 : i32
    %c0_i32_0 = arith.constant 0 : i32
    return %c0_i32, %arg0 : i32, i32
  }
  func.func @transform_1(%arg0: i32) -> (i32, i32) {
    %c0_i32 = arith.constant 0 : i32
    %c0_i32_0 = arith.constant 0 : i32
    %c0_i32_1 = arith.constant 0 : i32
    return %c0_i32, %c0_i32_0 : i32, i32
  }
  func.func @transform_2(%arg0: i32) -> (i32, i32) {
    %c0_i32 = arith.constant 0 : i32
    %c0_i32_0 = arith.constant 0 : i32
    %c0_i32_1 = arith.constant 0 : i32
    return %c0_i32, %c0_i32_0 : i32, i32
  }
  func.func @transform_3(%arg0: i32) -> (i32, i32) {
    %c0_i32 = arith.constant 0 : i32
    %c0_i32_0 = arith.constant 0 : i32
    %c0_i32_1 = arith.constant 0 : i32
    return %c0_i32, %c0_i32_0 : i32, i32
  }
  func.func @transform_4(%arg0: i32) -> i32 {
    %c0_i32 = arith.constant 0 : i32
    %c0_i32_0 = arith.constant 0 : i32
    return %c0_i32 : i32
  }
  func.func @transform_5(%arg0: i32) -> (i32, i32) {
    %c0_i32 = arith.constant 0 : i32
    %c0_i32_0 = arith.constant 0 : i32
    return %arg0, %c0_i32 : i32, i32
  }
  func.func @transform_6(%arg0: i32) -> (i32, i32) {
    %c0_i32 = arith.constant 0 : i32
    %c0_i32_0 = arith.constant 0 : i32
    return %arg0, %c0_i32 : i32, i32
  }
  func.func @transform_7(%arg0: i32) -> (i32, i32, i32) {
    %c0_i32 = arith.constant 0 : i32
    %c0_i32_0 = arith.constant 0 : i32
    %c0_i32_1 = arith.constant 0 : i32
    return %arg0, %c0_i32, %c0_i32_0 : i32, i32, i32
  }
}

</mosaic_0001>

<bundles_post_ra>
// kernel: tpu_custom_call.1
= control target key start
LH: loop header
LB: loop body
LE: loop exit
PB: predicated region body
PF: predicated region fallthrough
CT: control target
= control target key end

     0   :  { %13 = vsyncpa [#allocation5], 0  ;;  %s564_s0 = inlined_call_operand.vmem [shape: bf16[16,128], index: 0, kind: input, shape index: {}]   ;;  %s565_s1 = inlined_call_operand.vmem [shape: bf16[32,16], index: 1, kind: input, shape index: {}]   ;;  %s566_s2 = inlined_call_operand.vmem [shape: f32[32,1], index: 2, kind: input, shape index: {}]   ;;  %s567_s3 = inlined_call_operand.vmem [shape: f32[1,32], index: 3, kind: input, shape index: {}]   ;;  %s568_s4 = inlined_call_operand.vmem [shape: f32[2], index: 4, kind: input, shape index: {}]   ;;  %s569_s5 = inlined_call_operand.vmem [shape: f32[1,128], index: 5, kind: input, shape index: {}]   ;;  %s570_s6 = inlined_call_operand.hbm [shape: bf16[1,128], index: 6, kind: output, shape index: {0}]   ;;  %s571_s7 = inlined_call_operand.hbm [shape: f32[1,1,1], index: 7, kind: output, shape index: {1}]  }
   0x1   :  { %14 = vsyncpa [#allocation4], 0 }
   0x2   :  { %15 = vsyncpa [#allocation8], 0  ;;  %s30_s26 = sshll.u32 %s568_s4, 4  ;;  %s31_s26 = int_to_ptr.vmem [resolvable:$true] %s30_s26 }
   0x3   :  { %s398_s27 = scalar_lea.vmem %s31_s26, 16  ;;  %p403_p1 = scmp.lt.s32.totalorder %s31_s26, %s31_s26 }
   0x4   :  { %p399_p0 = scmp.ne.s32.totalorder %s31_s26, %s398_s27  ;;  %p404_p2 = scmp.lt.s32.totalorder %s398_s27, %s398_s27 }
   0x6   :  { %p405_p3 = por %p404_p2, %p403_p1 }
   0x8   :  { %p406_p4 = pnand %p405_p3, %p399_p0 }
   0xa   :  { %409 = shalt.err (!%p406_p4)
}
   0xb   :  { %s460_s28 = smov [#allocation3]  }
   0xc   :  { %33 = dma.vmem_to_smem %s31_s26, 16, %s460_s28, [#allocation5]  }
   0xd   :  { %454 = dma.done.wait [#allocation5], 16  }
   0xe   :  { %455 = vsyncadd [#allocation5], 4294967280 }
   0xf   :  { %39 = sfence }
  0x10   :  { %v389_v0 = vld [vmem:[%s564_s0] sm:$0xff]   ;;  %vm87_vm0 = vcmask 130048   ;;  %v391_v2 = vld [vmem:[%s565_s1 + $0x8] sm:$0xff]   ;;  %v461_v3 = vmov 0   ;;  %v49_v5 = vld [vmem:[%s566_s2 + $0x10] sm:$0xff]  ;;  %v462_v8 = vmov 0.0|0.0   ;;  %v287_v45 = vlaneseq }
  0x11   :  { %v390_v1 = vld [vmem:[%s565_s1] sm:$0xff]   ;;  %353 = vmatprep.subr.bf16.mxu0 %v389_v0  ;;  %387 = vset.pattern.permute.xlu0 %v461_v3  ;;  %v48_v6 = vld [vmem:[%s566_s2 + $0x8] sm:$0xff]  ;;  %v50_v7 = vld [vmem:[%s566_s2 + $0x18] sm:$0xff]  ;;  %vm463_vm1 = vmmov 0   ;;  %v464_v9 = vmov 0.0   ;;  %vm150_vm2 = vcmask 261120  }
  0x12   :  { %354 = vmatpush3.bf16.msra.mxu0 %v389_v0  ;;  %355 = vmatprep.mubr.msk.bf16.mxu0 %vm87_vm0, %v390_v1  ;;  %v47_v4 = vld [vmem:[%s566_s2] sm:$0xff]  ;;  %s147_s18 = sld [smem:[#allocation3]]  ;;  %vm227_vm3 = vcmask 1040384   ;;  %vm228_vm4 = vsmask.f32 256  ;;  %s344_s20 = sld [smem:[#allocation3 + $0x1]] }
  0x13   :  { %53 = vperm.xlu0 %387, %v47_v4   ;;  %388 = vset.pattern.permute.xlu1 %v461_v3  ;;  %v148_v28 = vld [vmem:[%s567_s3] sm:$0x1]  ;;  %vm229_vm5 = vmand %vm227_vm3, %vm228_vm4  ;;  %v230_v35 = vld [vmem:[#allocation6] sm:$0x1]  ;;  %v288_v49 = vshrl.u32 %v287_v45, 7  ;;  %v293_v59 = vand.u32 127, %v287_v45 }
  0x14   :  { %63 = vperm.xlu1 %388, %v49_v5   ;;  %370 = vmatprep.subr.bf16.mxu1 %v462_v8  ;;  %v233_v42 = vld [vmem:[%s569_s5] sm:$0x1]  ;;  %s465_s5 = smov [#allocation6]  }
  0x15   :  { %356 = vmatmul.mubr.msk.bf16.vlgmr.msra.gmra.mrb[0].mxu0 %vm87_vm0, %v391_v2  ;;  %367 = vmatprep.mubr.msk.f32.mxu1 %vm463_vm1, %v464_v9  ;;  %v234_v43 = vmul.f32 0.95, %v233_v42  ;;  %v289_v58 = vmul.u32 128, %v288_v49  ;;  %s315_s21 = sshll.u32 %s465_s5, 4  ;;  %s316_s21 = int_to_ptr.vmem [resolvable:$true] %s315_s21 }
  0x16   :  { %s410_s22 = scalar_lea.vmem %s316_s21, 16  ;;  %s414_s23 = scalar_lea.vmem %s316_s21, 32 }
  0x17   :  { %58 = vperm.xlu0 %387, %v48_v6   ;;  %v235_v46 = vadd.f32 0.025, %v234_v43  ;;  %v294_v3 = vadd.s32 %v293_v59, %v289_v58  ;;  %p411_p5 = scmp.ne.s32.totalorder %s316_s21, %s410_s22  ;;  %p415_p6 = scmp.lt.s32.totalorder %s316_s21, %s316_s21 }
  0x18   :  { %68 = vperm.xlu1 %388, %v50_v7   ;;  %v149_v29 = vstv %s147_s18  ;;  %v255_v48 = vstv %s344_s20  ;;  %p416_p7 = scmp.lt.s32.totalorder %s414_s23, %s410_s22 }
  0x19   :  { %v256_v53 = vmul.f32 %v255_v48, %v235_v46  ;;  %v258_v54 = vsub.f32 1.0, %v235_v46  ;;  %vm295_vm8 = vcmp.lt.s32.totalorder %v294_v3, 8 }
  0x1a   :  { %p417_p8 = por %p416_p7, %p415_p6 }
  0x1c   :  { %p418_p9 = pnand %p417_p8, %p411_p5 }
  0x92   :  { %v54_v11 = vpop.permute.xlu0 %53 }
  0x93   :  { %v64_v10 = vpop.permute.xlu1 %63 }
  0x96   :  { %v59_v18 = vpop.permute.xlu0 %58 }
  0x97   :  { %v69_v13 = vpop.permute.xlu1 %68 }
  0xe8   :  { %v357_v12 = vpop.f32.mrb[0].mxu0 }
  0xe9   :  { %v137_v14 = vadd.f32 %v357_v12, %v64_v10  ;;  %v128_v15 = vpop.f32.mrb[1].mxu0 }
  0xea   :  { %v129_v16 = vadd.f32 %v128_v15, %v54_v11  ;;  %v358_v17 = vpop.f32.mrb[2].mxu0 }
  0xeb   :  { %v140_v19 = vadd.f32 %v358_v17, %v69_v13  ;;  %v131_v20 = vpop.f32.mrb[3].mxu0  ;;  %v145_v22 = vmax.f32 %v137_v14, 0.0 }
  0xec   :  { %v132_v21 = vadd.f32 %v131_v20, %v59_v18  ;;  %v143_v24 = vmax.f32 %v129_v16, 0.0 }
  0xed   :  { %v146_v23 = vmax.f32 %v140_v19, 0.0 }
  0xee   :  { %v144_v25 = vmax.f32 %v132_v21, 0.0 }
  0xef   :  { %v374_v26 = vpack.c.bf16 %v146_v23, %v145_v22 }
  0xf0   :  { %v371_v27 = vpack.c.bf16 %v144_v25, %v143_v24 }
  0xf2   :  { %372 = vmatpush3.bf16.msra.mxu1 %v371_v27 }
  0xf3   :  { %373 = vmatprep.subr.bf16.mxu1 %v462_v8 }
  0xf6   :  { %375 = vmatpush3.bf16.msra.mxu1 %v374_v26 }
  0xf9   :  { %368 = vmatmul.mubr.msk.f32.vlgmr.msra.gmra.mrb[0].mxu1 %vm150_vm2, %v148_v28 }
 0x1cc   :  { %v220_v30 = vpop.f32.mrb[0].mxu1 }
 0x1cd   :  { %v221_v31 = vadd.f32 %v220_v30, %v149_v29  ;;  %v369_v32 = vpop.f32.mrb[1].mxu1 }
 0x1cf   :  { %224 = vst [vmem:[#allocation2] sm:$0x1] %v221_v31 }
 0x1d6   :  { %v225_v33 = vld [vmem:[#allocation2] sm:$0x1] }
 0x1d7   :  { %v237_v34 = vand.u32 2147483647, %v225_v33  ;;  %v226_v36 = vpack.c.bf16 %v225_v33, %v225_v33  ;;  %v252_v51 = vsub.f32 0.0, %v225_v33  ;;  %v250_v60 = vmax.f32 %v225_v33, 0.0 }
 0x1d8   :  { %vm261_vm7 = vcmp.ge.f32.partialorder %v225_v33, 0.0 }
 0x1d9   :  { %v238_v37 = vsub.f32 0.0, %v237_v34  ;;  %v231_v38 = vsel %vm229_vm5, %v226_v36, %v230_v35  ;;  %v253_v61 = vmax.f32 %v252_v51, 0.0 }
 0x1da   :  { %232 = vst [vmem:[#allocation6] sm:$0x1] %v231_v38 }
 0x1db   :  { %v239_v39 = vmul.f32 1.442695, %v238_v37 }
 0x1dd   :  { %392 = vpow2.f32 %v239_v39 }
 0x1e7   :  { %v393_v40 = vpop.eup %392 }
 0x1e8   :  { %v241_v41 = vadd.f32 1.0, %v393_v40  ;;  %v244_v44 = vmul.f32 -0.5, %v393_v40  ;;  %v247_v50 = vand.u32 2147483647, %v393_v40  ;;  %v262_v63 = vsel %vm261_vm7, %v393_v40, 1.0 }
 0x1ea   :  { %394 = vlog2.f32 %v241_v41  ;;  %v245_v47 = vadd.f32 1.0, %v244_v44  ;;  %vm248_vm6 = vcmp.lt.f32.partialorder %v247_v50, 0.0004427343 }
 0x1eb   :  { %396 = vrcp.f32 %v241_v41 }
 0x1ec   :  { %v246_v57 = vmul.f32 %v393_v40, %v245_v47 }
 0x1f4   :  { %v395_v52 = vpop.eup %394 }
 0x1f5   :  { %v397_v55 = vpop.eup %396  ;;  %v243_v56 = vmul.f32 0.6931472, %v395_v52 }
 0x1f6   :  { %v265_v2 = vmul.f32 %v397_v55, %v262_v63 }
 0x1f7   :  { %v249_v62 = vsel %vm248_vm6, %v246_v57, %v243_v56 }
 0x1f8   :  { %v251_v0 = vadd.f32 %v250_v60, %v249_v62  ;;  %v254_v1 = vadd.f32 %v253_v61, %v249_v62  ;;  %v266_v7 = vmul.f32 %v265_v2, %v265_v2 }
 0x1fa   :  { %v257_v4 = vmul.f32 %v256_v53, %v254_v1  ;;  %v259_v5 = vmul.f32 %v258_v54, %v251_v0 }
 0x1fc   :  { %v260_v6 = vadd.f32 %v259_v5, %v257_v4 }
 0x1fe   :  { %v267_v8 = vmul.f32 %v266_v7, %v260_v6 }
 0x200   :  { %v269_v9 = vsel %vm227_vm3, %v267_v8, 0.0  ;;  %v296_v10 = vsel %vm295_vm8, %v267_v8, 0.0 }
 0x201   :  { %270 = vadd.xlane.f32.xlu0 %v269_v9  ;;  %v297_v11 = vsel %vm227_vm3, %v296_v10, 0.0 }
 0x202   :  { %298 = vadd.xlane.f32.xlu1 %v297_v11 }
 0x203   :  { %421 = shalt.err (!%p418_p9)
}
 0x204   :  { %s422_s26 = scalar_lea.hbm %s570_s6, 16 }
 0x205   :  { %p423_p10 = scmp.ne.s32.totalorder %s570_s6, %s422_s26  ;;  %p426_p11 = scmp.lt.u32.totalorder %s422_s26, %s570_s6 }
 0x207   :  { %p428_p12 = pnand %p426_p11, %p423_p10 }
 0x209   :  { %431 = shalt.err (!%p428_p12)
}
 0x20a   :  { %318 = dma.vmem_to_hbm [thread:$0]  %s316_s21, 16, %s570_s6, [#allocation4]   ;;  %vm280_vm9 = vcmask 0  }
 0x20b   :  { %s466_s9 = smov [#allocation7]  }
 0x20c   :  { %s325_s10 = sshll.u32 %s466_s9, 4  ;;  %s326_s10 = int_to_ptr.vmem [resolvable:$true] %s325_s10 }
 0x20d   :  { %s432_s12 = scalar_lea.vmem %s326_s10, 16  ;;  %s436_s13 = scalar_lea.vmem %s326_s10, 32 }
 0x20e   :  { %p433_p13 = scmp.ne.s32.totalorder %s326_s10, %s432_s12  ;;  %p437_p0 = scmp.lt.s32.totalorder %s326_s10, %s326_s10 }
 0x20f   :  { %p438_p1 = scmp.lt.s32.totalorder %s436_s13, %s432_s12 }
 0x211   :  { %p439_p2 = por %p438_p1, %p437_p0 }
 0x213   :  { %p440_p3 = pnand %p439_p2, %p433_p13 }
 0x28e   :  { %v271_v12 = vpop.xlane.xlu0 %270 }
 0x28f   :  { %v272_v13 = vrot.slane %v271_v12, 4  ;;  %v299_v14 = vpop.xlane.xlu1 %298 }
 0x290   :  { %v300_v15 = vrot.slane %v299_v14, 4 }
 0x291   :  { %v273_v16 = vadd.f32 %v272_v13, %v271_v12 }
 0x292   :  { %v301_v17 = vadd.f32 %v300_v15, %v299_v14 }
 0x293   :  { %v274_v18 = vrot.slane %v273_v16, 2 }
 0x294   :  { %v302_v19 = vrot.slane %v301_v17, 2 }
 0x295   :  { %v275_v20 = vadd.f32 %v274_v18, %v273_v16 }
 0x296   :  { %v303_v21 = vadd.f32 %v302_v19, %v301_v17 }
 0x297   :  { %v276_v22 = vrot.slane %v275_v20, 1 }
 0x298   :  { %v304_v23 = vrot.slane %v303_v21, 1 }
 0x299   :  { %v277_v24 = vadd.f32 %v276_v22, %v275_v20 }
 0x29a   :  { %v305_v25 = vadd.f32 %v304_v23, %v303_v21 }
 0x29b   :  { %376 = vpush %v277_v24 }
 0x29c   :  { %378 = vpush %v305_v25 }
 0x2cc   :  { %s377_s6 = spop %376 }
 0x2cd   :  { %v279_v26 = vstv %s377_s6  ;;  %s379_s11 = spop %378 }
 0x2ce   :  { %281 = vst.msk [vmem:[#allocation7] sm:$0x1] %vm280_vm9, %v279_v26  ;;  %v307_v27 = vstv %s379_s11 }
 0x2cf   :  { %308 = vst.msk [vmem:[#allocation7] sm:$0x1] %vm280_vm9, %v307_v27 }
 0x2d0   :  { %443 = shalt.err (!%p440_p3)
}
 0x2d1   :  { %s444_s15 = scalar_lea.hbm %s571_s7, 16 }
 0x2d2   :  { %p445_p4 = scmp.ne.s32.totalorder %s571_s7, %s444_s15  ;;  %p448_p5 = scmp.lt.u32.totalorder %s444_s15, %s571_s7 }
 0x2d4   :  { %p450_p6 = pnand %p448_p5, %p445_p4 }
 0x2d6   :  { %453 = shalt.err (!%p450_p6)
}
 0x2d7   :  { %328 = dma.vmem_to_hbm [thread:$0]  %s326_s10, 16, %s571_s7, [#allocation8]  }
 0x2d8   :  { %456 = dma.done.wait [#allocation4], 16  }
 0x2d9   :  { %457 = vsyncadd [#allocation4], 4294967280 }
 0x2da   :  { %458 = dma.done.wait [#allocation8], 16  }
 0x2db   :  { %459 = vsyncadd [#allocation8], 4294967280 }
 0x2dc   :  { %335 = vsyncpa [#allocation4], 1 }
 0x2dd   :  { %336 = vsyncpa [#allocation8], 1 }
 0x2de   :  { %337 = vsyncpa [#allocation5], 1 }

</bundles_post_ra>
